<compile_context>
chip_gen: v7x
topology: tpu7x:2x2x1
jax: 0.10.0
libtpu: 0.0.40
codegen_flags: <defaults>
</compile_context>

<pallas_src>
import functools

import jax
import jax.numpy as jnp
from jax import lax
from jax.experimental import pallas as pl
from jax.experimental.pallas import tpu as pltpu

BN_EPS = 1e-5  # nn.BatchNorm1d default


def _predictor_kernel(*refs, apply_dropout):
    if apply_dropout:
        x_ref, wt_ref, b_ref, g_ref, be_ref, keep_ref, o_ref, acc_ref = refs
    else:
        x_ref, wt_ref, b_ref, g_ref, be_ref, o_ref, acc_ref = refs
        keep_ref = None

    k = pl.program_id(1)

    # ---- init accumulator at first reduction step ----
    @pl.when(k == 0)
    def _init():
        acc_ref[...] = jnp.zeros_like(acc_ref)

    # ---- Linear partial product (MXU, f32 accumulate) ----
    acc_ref[...] += jnp.dot(x_ref[...], wt_ref[...],
                            preferred_element_type=jnp.float32)

    # ---- finalize: bias + BatchNorm1d (training stats over full N) + ReLU
    #      + (optional) dropout mask at last reduction step ----
    @pl.when(k == pl.num_programs(1) - 1)
    def _finalize():
        h = acc_ref[...] + b_ref[...]
        n = h.shape[0]                       # full batch is resident (N untiled)
        mean = jnp.sum(h, axis=0, keepdims=True) * (1.0 / n)
        c = h - mean
        var = jnp.sum(c * c, axis=0, keepdims=True) * (1.0 / n)   # biased, like PyTorch
        # gamma/beta already carry the 1/(1-p) dropout scale (folded wrapper-side)
        y = c * lax.rsqrt(var + BN_EPS) * g_ref[...] + be_ref[...]
        y = jnp.maximum(y, 0.0)              # ReLU
        if keep_ref is not None:
            y = y * keep_ref[...]            # 0/1 mask; scale already folded
        o_ref[...] = y.astype(o_ref.dtype)


def _choose_tile(dim, pref):
    """Largest clean tile: full dim if small, else a divisor that is a
    multiple of 128 (keeps the (8,128) constraint and exact grid coverage)."""
    if dim <= pref:
        return dim
    if dim % pref == 0:
        return pref
    if dim % 128 == 0:
        return 128
    return dim


def init_predictor_params(key, in_dim, out_dim):
    """One-time parameter init.  Weight is stored PRE-TRANSPOSED as
    (in_dim, out_dim) so the forward pass never pays a transpose."""
    kw, kb = jax.random.split(key)
    bound = 1.0 / (in_dim ** 0.5)
    wt = jax.random.uniform(kw, (in_dim, out_dim), jnp.float32, -bound, bound)
    b = jax.random.uniform(kb, (out_dim,), jnp.float32, -bound, bound)
    gamma = jnp.ones((out_dim,), jnp.float32)   # BatchNorm1d default weight
    beta = jnp.zeros((out_dim,), jnp.float32)   # BatchNorm1d default bias
    return wt, b, gamma, beta


def predictor_forward(x, wt, b, gamma, beta, *, use_dropout, drop_rate,
                      dropout_key=None):
    """x: (N, in_dim); wt: (in_dim, out_dim) pre-transposed; b/gamma/beta: (out_dim,)."""
    n, in_dim = x.shape
    out_dim = wt.shape[1]
    assert wt.shape == (in_dim, out_dim)

    apply_dropout = bool(use_dropout) and drop_rate > 0.0

    # Fold the inverted-dropout scale into gamma/beta (positive scale commutes
    # with ReLU and with the 0/1 keep mask) -> leaner VALU epilogue in-kernel.
    scale = 1.0 / (1.0 - drop_rate) if apply_dropout else 1.0
    b2 = b.reshape(1, out_dim).astype(jnp.float32)
    g2 = (gamma * scale).reshape(1, out_dim).astype(jnp.float32)
    be2 = (beta * scale).reshape(1, out_dim).astype(jnp.float32)

    tn = _choose_tile(out_dim, 256)   # feature tile (parallel)
    tk = _choose_tile(in_dim, 512)    # reduction tile (arbitrary)
    grid = (out_dim // tn, in_dim // tk)

    in_specs = [
        pl.BlockSpec((n, tk), lambda j, k: (0, k)),    # x        (N untiled!)
        pl.BlockSpec((tk, tn), lambda j, k: (k, j)),   # wt
        pl.BlockSpec((1, tn), lambda j, k: (0, j)),    # bias
        pl.BlockSpec((1, tn), lambda j, k: (0, j)),    # gamma (scaled)
        pl.BlockSpec((1, tn), lambda j, k: (0, j)),    # beta  (scaled)
    ]
    args = [x, wt, b2, g2, be2]

    if apply_dropout:
        if dropout_key is None:
            dropout_key = jax.random.PRNGKey(0)
        # TODO(synk): mask is generated wrapper-side with jax.random; the
        # in-kernel pltpu PRNG (prng_seed/prng_random_bits) is TPU-Mosaic-only
        # and has no interpret/CPU lowering.
        keep = jax.random.bernoulli(dropout_key, 1.0 - drop_rate,
                                    (n, out_dim)).astype(x.dtype)
        in_specs.append(pl.BlockSpec((n, tn), lambda j, k: (0, j)))
        args.append(keep)

    kernel = functools.partial(_predictor_kernel, apply_dropout=apply_dropout)

    return pl.pallas_call(
        kernel,
        out_shape=jax.ShapeDtypeStruct((n, out_dim), x.dtype),
        grid=grid,
        in_specs=in_specs,
        out_specs=pl.BlockSpec((n, tn), lambda j, k: (0, j)),
        scratch_shapes=[pltpu.VMEM((n, tn), jnp.float32)],
        compiler_params=pltpu.CompilerParams(
            dimension_semantics=("parallel", "arbitrary"),
            vmem_limit_bytes=48 * 1024 * 1024,   # headroom for v7x's 64 MiB VMEM
        ),
    )(*args)


def ref_forward_no_dropout(x, wt, b, gamma, beta):
    h = x @ wt + b
    mean = h.mean(axis=0, keepdims=True)
    var = ((h - mean) ** 2).mean(axis=0, keepdims=True)
    y = (h - mean) / jnp.sqrt(var + BN_EPS) * gamma + beta
    return jnp.maximum(y, 0.0)


if __name__ == "__main__":
    # Small shapes consistent with the module: x is (batch, in_dim).
    N, IN_DIM, OUT_DIM = 8, 32, 16
    key = jax.random.PRNGKey(0)
    kx, kparam, kdrop = jax.random.split(key, 3)

    x = jax.random.normal(kx, (N, IN_DIM), dtype=jnp.float32)
    wt, b, gamma, beta = init_predictor_params(kparam, IN_DIM, OUT_DIM)

    # --- correctness: dropout disabled ---
    out = predictor_forward(x, wt, b, gamma, beta,
                            use_dropout=False, drop_rate=0.0)
    out = jax.block_until_ready(out)
    ref = ref_forward_no_dropout(x, wt, b, gamma, beta)
    assert jnp.allclose(out, ref, atol=1e-4, rtol=1e-4), "mismatch vs reference"

    # --- dropout path: verify inverted-dropout semantics with the same mask ---
    P = 0.25
    out_d = predictor_forward(x, wt, b, gamma, beta,
                              use_dropout=True, drop_rate=P, dropout_key=kdrop)
    out_d = jax.block_until_ready(out_d)
    keep = jax.random.bernoulli(kdrop, 1.0 - P, (N, OUT_DIM)).astype(jnp.float32)
    ref_d = ref * keep * (1.0 / (1.0 - P))
    assert out_d.shape == (N, OUT_DIM)
    assert jnp.allclose(out_d, ref_d, atol=1e-4, rtol=1e-4), "dropout mismatch"

    print("KERNEL_OK")
</pallas_src>

<mosaic_0001>
module attributes {stable_mosaic.version = 11 : i64} {
  func.func @_predictor_kernel(%arg0: i32, %arg1: i32, %arg2: memref<8x32xf32, #tpu.memory_space<vmem>>, %arg3: memref<32x16xf32, #tpu.memory_space<vmem>>, %arg4: memref<1x16xf32, #tpu.memory_space<vmem>>, %arg5: memref<1x16xf32, #tpu.memory_space<vmem>>, %arg6: memref<1x16xf32, #tpu.memory_space<vmem>>, %arg7: memref<8x16xf32, #tpu.memory_space<vmem>>, %arg8: memref<8x16xf32, #tpu.memory_space<vmem>>) attributes {dimension_semantics = [#tpu.dimension_semantics<parallel>, #tpu.dimension_semantics<arbitrary>], iteration_bounds = array<i64: 1, 1>, scalar_prefetch = 0 : i64, scratch_operands = 1 : i64, tpu.core_type = #tpu.core_type<tc>, window_params = [{transform_indices = @transform_0, window_bounds = array<i64: 8, 32>}, {transform_indices = @transform_1, window_bounds = array<i64: 32, 16>}, {transform_indices = @transform_2, window_bounds = array<i64: 1, 16>}, {transform_indices = @transform_3, window_bounds = array<i64: 1, 16>}, {transform_indices = @transform_4, window_bounds = array<i64: 1, 16>}, {transform_indices = @transform_5, window_bounds = array<i64: 8, 16>}]} {
    %c0_i32 = arith.constant 0 : i32
    %0 = arith.cmpi eq, %arg1, %c0_i32 : i32
    %1 = arith.extui %0 : i1 to i32
    %c0_i32_0 = arith.constant 0 : i32
    %2 = arith.cmpi ne, %1, %c0_i32_0 : i32
    scf.if %2 {
      %cst_10 = arith.constant 0.000000e+00 : f32
      %12 = vector.broadcast %cst_10 : f32 to vector<8x16xf32>
      %c0_11 = arith.constant 0 : index
      %c0_12 = arith.constant 0 : index
      %13 = vector.load %arg8[%c0_11, %c0_12] : memref<8x16xf32, #tpu.memory_space<vmem>>, vector<8x16xf32>
      tpu.vector_store %arg8[%c0_11, %c0_12], %12 {strides = array<i32>} : memref<8x16xf32, #tpu.memory_space<vmem>>, vector<8x16xf32>,
    } else {
    }
    %c0 = arith.constant 0 : index
    %c0_1 = arith.constant 0 : index
    %3 = vector.load %arg8[%c0, %c0_1] : memref<8x16xf32, #tpu.memory_space<vmem>>, vector<8x16xf32>
    %c0_2 = arith.constant 0 : index
    %c0_3 = arith.constant 0 : index
    %4 = vector.load %arg2[%c0_2, %c0_3] : memref<8x32xf32, #tpu.memory_space<vmem>>, vector<8x32xf32>
    %c0_4 = arith.constant 0 : index
    %c0_5 = arith.constant 0 : index
    %5 = vector.load %arg3[%c0_4, %c0_5] : memref<32x16xf32, #tpu.memory_space<vmem>>, vector<32x16xf32>
    %cst = arith.constant dense<0.000000e+00> : vector<8x16xf32>
    %6 = tpu.matmul %4, %5, %cst {dimension_numbers = #tpu.dot_dimension_numbers<[1], [0], [0], [1], [0, 0, 1, 1], [], []>} : vector<8x32xf32>, vector<32x16xf32>, vector<8x16xf32> -> vector<8x16xf32>
    %7 = arith.addf %3, %6 : vector<8x16xf32>
    %c0_6 = arith.constant 0 : index
    %c0_7 = arith.constant 0 : index
    %8 = vector.load %arg8[%c0_6, %c0_7] : memref<8x16xf32, #tpu.memory_space<vmem>>, vector<8x16xf32>
    tpu.vector_store %arg8[%c0_6, %c0_7], %7 {strides = array<i32>} : memref<8x16xf32, #tpu.memory_space<vmem>>, vector<8x16xf32>,
    %c0_i32_8 = arith.constant 0 : i32
    %9 = arith.cmpi eq, %arg1, %c0_i32_8 : i32
    %10 = arith.extui %9 : i1 to i32
    %c0_i32_9 = arith.constant 0 : i32
    %11 = arith.cmpi ne, %10, %c0_i32_9 : i32
    scf.if %11 {
      %c0_10 = arith.constant 0 : index
      %c0_11 = arith.constant 0 : index
      %12 = vector.load %arg8[%c0_10, %c0_11] : memref<8x16xf32, #tpu.memory_space<vmem>>, vector<8x16xf32>
      %c0_12 = arith.constant 0 : index
      %c0_13 = arith.constant 0 : index
      %13 = vector.load %arg4[%c0_12, %c0_13] : memref<1x16xf32, #tpu.memory_space<vmem>>, vector<1x16xf32>
      %14 = vector.broadcast %13 : vector<1x16xf32> to vector<8x16xf32>
      %15 = arith.addf %12, %14 : vector<8x16xf32>
      %cst_14 = arith.constant dense<0.000000e+00> : vector<16xf32>
      %16 = vector.multi_reduction <add>, %15, %cst_14 [0] : vector<8x16xf32> to vector<16xf32>
      %17 = vector.shape_cast %16 : vector<16xf32> to vector<1x16xf32>
      %cst_15 = arith.constant 1.250000e-01 : f32
      %18 = vector.broadcast %cst_15 : f32 to vector<1x16xf32>
      %19 = arith.mulf %17, %18 : vector<1x16xf32>
      %20 = vector.broadcast %19 : vector<1x16xf32> to vector<8x16xf32>
      %21 = arith.subf %15, %20 : vector<8x16xf32>
      %22 = arith.mulf %21, %21 : vector<8x16xf32>
      %cst_16 = arith.constant dense<0.000000e+00> : vector<16xf32>
      %23 = vector.multi_reduction <add>, %22, %cst_16 [0] : vector<8x16xf32> to vector<16xf32>
      %24 = vector.shape_cast %23 : vector<16xf32> to vector<1x16xf32>
      %cst_17 = arith.constant 1.250000e-01 : f32
      %25 = vector.broadcast %cst_17 : f32 to vector<1x16xf32>
      %26 = arith.mulf %24, %25 : vector<1x16xf32>
      %cst_18 = arith.constant 9.99999974E-6 : f32
      %27 = vector.broadcast %cst_18 : f32 to vector<1x16xf32>
      %28 = arith.addf %26, %27 : vector<1x16xf32>
      %29 = math.rsqrt %28 : vector<1x16xf32>
      %30 = vector.broadcast %29 : vector<1x16xf32> to vector<8x16xf32>
      %31 = arith.mulf %21, %30 : vector<8x16xf32>
      %c0_19 = arith.constant 0 : index
      %c0_20 = arith.constant 0 : index
      %32 = vector.load %arg5[%c0_19, %c0_20] : memref<1x16xf32, #tpu.memory_space<vmem>>, vector<1x16xf32>
      %33 = vector.broadcast %32 : vector<1x16xf32> to vector<8x16xf32>
      %34 = arith.mulf %31, %33 : vector<8x16xf32>
      %c0_21 = arith.constant 0 : index
      %c0_22 = arith.constant 0 : index
      %35 = vector.load %arg6[%c0_21, %c0_22] : memref<1x16xf32, #tpu.memory_space<vmem>>, vector<1x16xf32>
      %36 = vector.broadcast %35 : vector<1x16xf32> to vector<8x16xf32>
      %37 = arith.addf %34, %36 : vector<8x16xf32>
      %cst_23 = arith.constant 0.000000e+00 : f32
      %38 = vector.broadcast %cst_23 : f32 to vector<8x16xf32>
      %39 = arith.maximumf %37, %38 : vector<8x16xf32>
      %c0_24 = arith.constant 0 : index
      %c0_25 = arith.constant 0 : index
      %40 = vector.load %arg7[%c0_24, %c0_25] : memref<8x16xf32, #tpu.memory_space<vmem>>, vector<8x16xf32>
      tpu.vector_store %arg7[%c0_24, %c0_25], %39 {strides = array<i32>} : memref<8x16xf32, #tpu.memory_space<vmem>>, vector<8x16xf32>,
    } else {
    }
    return
  }
  func.func @transform_0(%arg0: i32, %arg1: i32) -> (i32, i32) {
    %c0_i32 = arith.constant 0 : i32
    %c0_i32_0 = arith.constant 0 : i32
    return %c0_i32, %arg1 : i32, i32
  }
  func.func @transform_1(%arg0: i32, %arg1: i32) -> (i32, i32) {
    %c0_i32 = arith.constant 0 : i32
    return %arg1, %arg0 : i32, i32
  }
  func.func @transform_2(%arg0: i32, %arg1: i32) -> (i32, i32) {
    %c0_i32 = arith.constant 0 : i32
    %c0_i32_0 = arith.constant 0 : i32
    return %c0_i32, %arg0 : i32, i32
  }
  func.func @transform_3(%arg0: i32, %arg1: i32) -> (i32, i32) {
    %c0_i32 = arith.constant 0 : i32
    %c0_i32_0 = arith.constant 0 : i32
    return %c0_i32, %arg0 : i32, i32
  }
  func.func @transform_4(%arg0: i32, %arg1: i32) -> (i32, i32) {
    %c0_i32 = arith.constant 0 : i32
    %c0_i32_0 = arith.constant 0 : i32
    return %c0_i32, %arg0 : i32, i32
  }
  func.func @transform_5(%arg0: i32, %arg1: i32) -> (i32, i32) {
    %c0_i32 = arith.constant 0 : i32
    %c0_i32_0 = arith.constant 0 : i32
    return %c0_i32, %arg0 : i32, i32
  }
}

</mosaic_0001>

<bundles_post_ra>
// kernel: tpu_custom_call.1
= control target key start
LH: loop header
LB: loop body
LE: loop exit
PB: predicated region body
PF: predicated region fallthrough
CT: control target
= control target key end

     0   :  { %vm25_vm0 = vcmask 130048   ;;  %v231_v3 = vmov 0.0|0.0   ;;  %v232_v6 = vmov 0.0   ;;  %s306_s0 = inlined_call_operand.vmem [shape: f32[8,32], index: 0, kind: input, shape index: {}]   ;;  %s307_s1 = inlined_call_operand.vmem [shape: f32[32,16], index: 1, kind: input, shape index: {}]   ;;  %s308_s2 = inlined_call_operand.vmem [shape: f32[1,16], index: 2, kind: input, shape index: {}]   ;;  %s309_s3 = inlined_call_operand.vmem [shape: f32[1,16], index: 3, kind: input, shape index: {}]   ;;  %s310_s4 = inlined_call_operand.vmem [shape: f32[1,16], index: 4, kind: input, shape index: {}]   ;;  %s311_s5 = inlined_call_operand.hbm [shape: f32[8,16], index: 5, kind: output, shape index: {}]  }
   0x1   :  { %v29_v0 = vld [vmem:[%s307_s1] sm:$0xff]  ;;  %v30_v1 = vld [vmem:[%s307_s1 + $0x8] sm:$0xff]  ;;  %v31_v2 = vld [vmem:[%s307_s1 + $0x10] sm:$0xff]  ;;  %195 = vmatprep.subr.bf16.mxu0 %v231_v3  ;;  %26 = vst.msk [vmem:[#allocation2] sm:$0xff] %vm25_vm0, %v232_v6 }
   0x2   :  { %v196_v4 = vpack.c.bf16 %v30_v1, %v29_v0  ;;  %v32_v5 = vld [vmem:[%s307_s1 + $0x18] sm:$0xff] }
   0x3   :  { %10 = vsyncpa [#allocation4], 0  ;;  %vm233_vm1 = vmmov 0   ;;  %v199_v7 = vpack.c.bf16 %v32_v5, %v31_v2  ;;  %v28_v8 = vld [vmem:[%s306_s0] sm:$0xff]  ;;  %vm33_vm2 = vcmask 261120   ;;  %s234_s6 = smov [#allocation3]  }
   0x4   :  { %192 = vmatprep.mubr.msk.f32.mxu0 %vm233_vm1, %v232_v6  ;;  %197 = vmatpush3.bf16.msra.mxu0 %v196_v4  ;;  %v176_v13 = vld [vmem:[%s308_s2] ss:$0 sm:$0xff]  ;;  %s167_s7 = sshll.u32 %s234_s6, 4  ;;  %s168_s7 = int_to_ptr.vmem [resolvable:$true] %s167_s7 }
   0x5   :  { %198 = vmatprep.subr.bf16.mxu0 %v231_v3  ;;  %v177_v36 = vld [vmem:[%s309_s3] ss:$0 sm:$0xff]  ;;  %s207_s8 = scalar_lea.vmem %s168_s7, 128  ;;  %p212_p1 = scmp.lt.s32.totalorder %s168_s7, %s168_s7 }
   0x6   :  { %v178_v38 = vld [vmem:[%s310_s4] ss:$0 sm:$0xff]  ;;  %p208_p0 = scmp.ne.s32.totalorder %s168_s7, %s207_s8  ;;  %p213_p2 = scmp.lt.s32.totalorder %s207_s8, %s207_s8 }
   0x8   :  { %200 = vmatpush3.bf16.msra.mxu0 %v199_v7  ;;  %v27_v9 = vld [vmem:[#allocation2] sm:$0xff]  ;;  %p214_p3 = por %p213_p2, %p212_p1 }
   0xa   :  { %p215_p4 = pnand %p214_p3, %p208_p0 }
   0xb   :  { %193 = vmatmul.mubr.msk.f32.vlgmr.msra.gmra.mrb[0].mxu0 %vm33_vm2, %v28_v8 }
  0xde   :  { %v103_v10 = vpop.f32.mrb[0].mxu0 }
  0xdf   :  { %v107_v11 = vadd.f32 %v103_v10, %v27_v9  ;;  %v194_v12 = vpop.f32.mrb[1].mxu0 }
  0xe1   :  { %109 = vst.msk [vmem:[#allocation2] sm:$0xff] %vm25_vm0, %v107_v11 }
  0xe8   :  { %v113_v14 = vld [vmem:[#allocation2] sm:$0xff] }
  0xe9   :  { %v121_v15 = vadd.f32 %v176_v13, %v113_v14 }
  0xeb   :  { %v122_v16 = vsel %vm25_vm0, %v121_v15, 0.0 }
  0xec   :  { %v123_v17 = vrot.slane %v122_v16, 4 }
  0xee   :  { %v124_v18 = vadd.f32 %v123_v17, %v122_v16 }
  0xf0   :  { %v125_v19 = vrot.slane %v124_v18, 2 }
  0xf2   :  { %v126_v20 = vadd.f32 %v125_v19, %v124_v18 }
  0xf4   :  { %v127_v21 = vrot.slane %v126_v20, 1 }
  0xf6   :  { %v128_v22 = vadd.f32 %v127_v21, %v126_v20 }
  0xf8   :  { %v129_v23 = vmul.f32 0.125, %v128_v22 }
  0xfa   :  { %v130_v24 = vsub.f32 %v121_v15, %v129_v23 }
  0xfc   :  { %v131_v25 = vmul.f32 %v130_v24, %v130_v24 }
  0xfe   :  { %v132_v26 = vsel %vm25_vm0, %v131_v25, 0.0 }
  0xff   :  { %v133_v27 = vrot.slane %v132_v26, 4 }
 0x101   :  { %v134_v28 = vadd.f32 %v133_v27, %v132_v26 }
 0x103   :  { %v135_v29 = vrot.slane %v134_v28, 2 }
 0x105   :  { %v136_v30 = vadd.f32 %v135_v29, %v134_v28 }
 0x107   :  { %v137_v31 = vrot.slane %v136_v30, 1 }
 0x109   :  { %v138_v32 = vadd.f32 %v137_v31, %v136_v30 }
 0x10b   :  { %v139_v33 = vmul.f32 0.125, %v138_v32 }
 0x10d   :  { %v140_v34 = vadd.f32 1e-05, %v139_v33 }
 0x10f   :  { %205 = vrsqrt.f32 %v140_v34 }
 0x119   :  { %v206_v35 = vpop.eup %205 }
 0x11a   :  { %v142_v37 = vmul.f32 %v206_v35, %v130_v24 }
 0x11c   :  { %v150_v39 = vmul.f32 %v177_v36, %v142_v37 }
 0x11e   :  { %v158_v40 = vadd.f32 %v178_v38, %v150_v39 }
 0x120   :  { %v159_v41 = vmax.f32 %v158_v40, 0.0 }
 0x122   :  { %160 = vst.msk [vmem:[#allocation3] sm:$0xff] %vm25_vm0, %v159_v41 }
 0x123   :  { %218 = shalt.err (!%p215_p4)
}
 0x124   :  { %s219_s10 = scalar_lea.hbm %s311_s5, 128 }
 0x125   :  { %p220_p5 = scmp.ne.s32.totalorder %s311_s5, %s219_s10  ;;  %p223_p6 = scmp.lt.u32.totalorder %s219_s10, %s311_s5 }
 0x127   :  { %p225_p7 = pnand %p223_p6, %p220_p5 }
 0x129   :  { %228 = shalt.err (!%p225_p7)
}
 0x12a   :  { %170 = dma.vmem_to_hbm [thread:$0]  %s168_s7, 128, %s311_s5, [#allocation4]  }
 0x12b   :  { %229 = dma.done.wait [#allocation4], 128  }
 0x12c   :  { %230 = vsyncadd [#allocation4], 4294967168 }
 0x12d   :  { %174 = vsyncpa [#allocation4], 1 }

</bundles_post_ra>
